<compile_context>
chip_gen: v7x
topology: tpu7x:2x2x1
jax: 0.10.0
libtpu: 0.0.40
codegen_flags: <defaults>
</compile_context>

<pallas_src>
import jax
import jax.numpy as jnp
from jax.experimental import pallas as pl
from jax.experimental.pallas import tpu as pltpu

LN_EPS = 1e-5  # torch.nn.LayerNorm default eps (elementwise_affine=False in FCLayers)


def _round_up(n, m):
    return ((n + m - 1) // m) * m


def _layernorm_relu(h):
    # f32 elementwise work; rsqrt lowers to the EUP.
    mu = jnp.mean(h, axis=-1, keepdims=True)
    var = jnp.mean((h - mu) ** 2, axis=-1, keepdims=True)
    h = (h - mu) * jax.lax.rsqrt(var + LN_EPS)
    return jnp.maximum(h, 0.0)


def decoder_nb_kernel(x_ref, lib_ref, w1_ref, b1_ref, w2_ref, b2_ref, rate_ref):
    # Layer 1: Linear (bf16 operands -> MXU, f32 accumulate) -> LayerNorm -> ReLU.
    h = jnp.dot(x_ref[...], w1_ref[...], preferred_element_type=jnp.float32)
    h = _layernorm_relu(h + b1_ref[...])

    # Layer 2: cast activations to bf16 only around the dot; VPU math stays f32.
    h = jnp.dot(h.astype(jnp.bfloat16), w2_ref[...],
                preferred_element_type=jnp.float32)
    h = _layernorm_relu(h + b2_ref[...])

    # Softmax over the full (un-tiled) gene axis, with the library scale folded
    # into the per-row reciprocal: px_rate = e * (exp(lib) / sum(e)).
    m = jnp.max(h, axis=-1, keepdims=True)
    e = jnp.exp(h - m)
    inv_denom = pl.reciprocal(jnp.sum(e, axis=-1, keepdims=True), approx=True)
    row_scale = jnp.exp(lib_ref[...]) * inv_denom          # [tile_b, 1] only
    rate_ref[...] = (e * row_scale).astype(rate_ref.dtype)


def _vmem_estimate(tile_b, n_in, n_hid, G, out_bytes):
    # Grid-varying blocks are double-buffered by the Pallas pipeliner.
    streamed = 2 * (tile_b * n_in * 2          # x tile (bf16)
                    + tile_b * 4               # library tile (f32)
                    + tile_b * G * out_bytes)  # output tile
    # Constant-index (VMEM-resident) weight/bias blocks; budget 2x in case the
    # pipeliner still allocates two buffers for them.
    resident = 2 * ((n_in * n_hid + n_hid * G) * 2 + (n_hid + G) * 4)
    # f32 intermediates (h, e, softmax temps).
    scratch = 4 * tile_b * max(n_hid, G) * 4
    return streamed + resident + scratch


def _pick_tile_b(B, n_in, n_hid, G, requested, out_bytes):
    # bf16 sublane packing: batch tiles (and batch padding) in multiples of 16.
    tile_b = max(16, _round_up(min(requested, _round_up(B, 16)), 16))
    # Shrink the tile for large gene counts so everything (incl. the f32
    # output block x2 buffers) stays well inside v7x's 64 MiB VMEM.
    while tile_b > 16 and _vmem_estimate(tile_b, n_in, n_hid, G, out_bytes) > (48 << 20):
        tile_b = max(16, _round_up(tile_b // 2, 16))
    Bp = _round_up(B, 16)
    # Guarantee >= 2 grid steps whenever the batch allows it so the "parallel"
    # batch axis shards across v7x's two TensorCores.
    if Bp >= 32 and Bp <= tile_b:
        tile_b = _round_up(Bp // 2, 16)
    Bp = _round_up(B, tile_b)
    return tile_b, Bp


def decoder_nb(x, w1, b1, w2, b2, library, px_r, *, tile_b=128,
               out_dtype=jnp.float32):
    B, n_in = x.shape
    n_hid = w1.shape[1]
    G = w2.shape[1]

    out_bytes = jnp.dtype(out_dtype).itemsize
    tile_b, Bp = _pick_tile_b(B, n_in, n_hid, G, tile_b, out_bytes)

    # Scoped-VMEM limit: above the 16/32 MiB v5e/v6e defaults when the tiles
    # need it, capped at 64 MiB so it is always physically valid on v7x.
    est = _vmem_estimate(tile_b, n_in, n_hid, G, out_bytes)
    vmem_limit = int(min(max(32 << 20, int(1.25 * est)), 64 << 20))

    # bf16 operands for the MXU (halves weight HBM/VMEM traffic); everything
    # elementwise stays f32 (v5e has no bf16 VPU/EUP path).
    x_bf = x.astype(jnp.bfloat16)
    w1_bf = w1.astype(jnp.bfloat16)
    w2_bf = w2.astype(jnp.bfloat16)
    b1_f = b1.astype(jnp.float32)
    b2_f = b2.astype(jnp.float32)
    lib_f = library.astype(jnp.float32)

    if Bp != B:
        # Zero-padded rows are numerically safe through LayerNorm/softmax
        # (eps guards the zero-variance case) and are sliced away below.
        pad = Bp - B
        x_bf = jnp.pad(x_bf, ((0, pad), (0, 0)))
        lib_f = jnp.pad(lib_f, ((0, pad), (0, 0)))

    grid = (Bp // tile_b,)

    rate = pl.pallas_call(
        decoder_nb_kernel,
        out_shape=jax.ShapeDtypeStruct((Bp, G), out_dtype),
        grid=grid,
        in_specs=[
            pl.BlockSpec((tile_b, n_in), lambda i: (i, 0)),   # x tile
            pl.BlockSpec((tile_b, 1), lambda i: (i, 0)),      # library tile
            pl.BlockSpec((n_in, n_hid), lambda i: (0, 0)),    # W1 (VMEM-resident)
            pl.BlockSpec((1, n_hid), lambda i: (0, 0)),       # b1 (VMEM-resident)
            pl.BlockSpec((n_hid, G), lambda i: (0, 0)),       # W2 (VMEM-resident)
            pl.BlockSpec((1, G), lambda i: (0, 0)),           # b2 (VMEM-resident)
        ],
        out_specs=pl.BlockSpec((tile_b, G), lambda i: (i, 0)),
        compiler_params=pltpu.CompilerParams(
            dimension_semantics=("parallel",),                # megacore on v7x
            vmem_limit_bytes=vmem_limit),
    )(x_bf, lib_f, w1_bf, b1_f, w2_bf, b2_f)

    # No extra HBM round-trip when the tile divides B; otherwise slice (lazy
    # under jit at the consumer).
    px_rate = rate if Bp == B else rate[:B]
    # theta = px_r.exp(): batch-independent (1, G) op, hoisted out of the kernel
    # so it is not recomputed / re-DMA'd every grid step.
    theta = jnp.exp(px_r.astype(jnp.float32))
    return px_rate, theta


if __name__ == "__main__":
    # Small shapes consistent with DecoderNB(n_input, n_output, n_hidden, n_layers=2).
    B = 20        # batch; deliberately NOT a multiple of the tile -> exercises padding
    N_IN = 32     # n_input (latent dim)
    N_HID = 128   # n_hidden (scVI default; keeps vregs / MXU K-depth full)
    N_OUT = 256   # n_output (genes); multiple of 128 -> lane-dense output stores
    TILE_B = 16   # bf16 sublane-aligned tile; gives a 2-step (pipelined) grid

    key = jax.random.PRNGKey(0)
    kx, klib, kpxr, kw1, kb1, kw2, kb2 = jax.random.split(key, 7)

    x = jax.random.normal(kx, (B, N_IN), dtype=jnp.float32)
    library = jax.random.normal(klib, (B, 1), dtype=jnp.float32)
    px_r = jax.random.normal(kpxr, (1, N_OUT), dtype=jnp.float32)

    # Deterministic synthetic parameters (not loading any checkpoint).
    w1 = jax.random.normal(kw1, (N_IN, N_HID), dtype=jnp.float32) * 0.1
    b1 = jax.random.normal(kb1, (1, N_HID), dtype=jnp.float32) * 0.01
    w2 = jax.random.normal(kw2, (N_HID, N_OUT), dtype=jnp.float32) * 0.1
    b2 = jax.random.normal(kb2, (1, N_OUT), dtype=jnp.float32) * 0.01

    px_rate, theta = decoder_nb(x, w1, b1, w2, b2, library, px_r, tile_b=TILE_B)
    jax.block_until_ready((px_rate, theta))

    # Pure-JAX f32 reference (bf16 MXU operands in the kernel loosen the tolerance).
    def ref(x, w1, b1, w2, b2, library, px_r):
        def lnrelu(h):
            mu = jnp.mean(h, -1, keepdims=True)
            var = jnp.mean((h - mu) ** 2, -1, keepdims=True)
            return jnp.maximum((h - mu) / jnp.sqrt(var + LN_EPS), 0.0)
        h = lnrelu(x @ w1 + b1)
        h = lnrelu(h @ w2 + b2)
        px_scale = jax.nn.softmax(h, axis=-1)
        return jnp.exp(library) * px_scale, jnp.exp(px_r)

    r_ref, t_ref = ref(x, w1, b1, w2, b2, library, px_r)
    assert px_rate.shape == (B, N_OUT) and theta.shape == (1, N_OUT)
    assert bool(jnp.all(jnp.isfinite(px_rate)))
    assert jnp.allclose(px_rate, r_ref, rtol=5e-2, atol=1e-4)
    assert jnp.allclose(theta, t_ref, rtol=1e-6, atol=1e-6)

    print("KERNEL_OK")
</pallas_src>

<mosaic_0001>
module attributes {stable_mosaic.version = 11 : i64} {
  func.func @decoder_nb_kernel(%arg0: i32, %arg1: memref<16x32xbf16, #tpu.memory_space<vmem>>, %arg2: memref<16x1xf32, #tpu.memory_space<vmem>>, %arg3: memref<32x128xbf16, #tpu.memory_space<vmem>>, %arg4: memref<1x128xf32, #tpu.memory_space<vmem>>, %arg5: memref<128x256xbf16, #tpu.memory_space<vmem>>, %arg6: memref<1x256xf32, #tpu.memory_space<vmem>>, %arg7: memref<16x256xf32, #tpu.memory_space<vmem>>) attributes {dimension_semantics = [#tpu.dimension_semantics<parallel>], iteration_bounds = array<i64: 2>, scalar_prefetch = 0 : i64, scratch_operands = 0 : i64, tpu.core_type = #tpu.core_type<tc>, window_params = [{transform_indices = @transform_0, window_bounds = array<i64: 16, 32>}, {transform_indices = @transform_1, window_bounds = array<i64: 16, 1>}, {pipeline_mode = #tpu.pipeline_mode<synchronous>, transform_indices = @transform_2, window_bounds = array<i64: 32, 128>}, {pipeline_mode = #tpu.pipeline_mode<synchronous>, transform_indices = @transform_3, window_bounds = array<i64: 1, 128>}, {pipeline_mode = #tpu.pipeline_mode<synchronous>, transform_indices = @transform_4, window_bounds = array<i64: 128, 256>}, {pipeline_mode = #tpu.pipeline_mode<synchronous>, transform_indices = @transform_5, window_bounds = array<i64: 1, 256>}, {transform_indices = @transform_6, window_bounds = array<i64: 16, 256>}]} {
    %c0 = arith.constant 0 : index
    %c0_0 = arith.constant 0 : index
    %0 = vector.load %arg1[%c0, %c0_0] : memref<16x32xbf16, #tpu.memory_space<vmem>>, vector<16x32xbf16>
    %c0_1 = arith.constant 0 : index
    %c0_2 = arith.constant 0 : index
    %1 = vector.load %arg3[%c0_1, %c0_2] : memref<32x128xbf16, #tpu.memory_space<vmem>>, vector<32x128xbf16>
    %cst = arith.constant dense<0.000000e+00> : vector<16x128xf32>
    %2 = tpu.matmul %0, %1, %cst {dimension_numbers = #tpu.dot_dimension_numbers<[1], [0], [0], [1], [0, 0, 1, 1], [], []>} : vector<16x32xbf16>, vector<32x128xbf16>, vector<16x128xf32> -> vector<16x128xf32>
    %c0_3 = arith.constant 0 : index
    %c0_4 = arith.constant 0 : index
    %3 = vector.load %arg4[%c0_3, %c0_4] : memref<1x128xf32, #tpu.memory_space<vmem>>, vector<1x128xf32>
    %4 = vector.broadcast %3 : vector<1x128xf32> to vector<16x128xf32>
    %5 = arith.addf %2, %4 : vector<16x128xf32>
    %cst_5 = arith.constant dense<0.000000e+00> : vector<16xf32>
    %6 = vector.multi_reduction <add>, %5, %cst_5 [1] : vector<16x128xf32> to vector<16xf32>
    %7 = vector.shape_cast %6 : vector<16xf32> to vector<16x1xf32>
    %cst_6 = arith.constant 1.280000e+02 : f32
    %8 = vector.broadcast %cst_6 : f32 to vector<16x1xf32>
    %9 = arith.divf %7, %8 : vector<16x1xf32>
    %10 = vector.broadcast %9 : vector<16x1xf32> to vector<16x128xf32>
    %11 = arith.subf %5, %10 : vector<16x128xf32>
    %12 = arith.mulf %11, %11 : vector<16x128xf32>
    %cst_7 = arith.constant dense<0.000000e+00> : vector<16xf32>
    %13 = vector.multi_reduction <add>, %12, %cst_7 [1] : vector<16x128xf32> to vector<16xf32>
    %14 = vector.shape_cast %13 : vector<16xf32> to vector<16x1xf32>
    %cst_8 = arith.constant 1.280000e+02 : f32
    %15 = vector.broadcast %cst_8 : f32 to vector<16x1xf32>
    %16 = arith.divf %14, %15 : vector<16x1xf32>
    %17 = vector.broadcast %9 : vector<16x1xf32> to vector<16x128xf32>
    %18 = arith.subf %5, %17 : vector<16x128xf32>
    %cst_9 = arith.constant 9.99999974E-6 : f32
    %19 = vector.broadcast %cst_9 : f32 to vector<16x1xf32>
    %20 = arith.addf %16, %19 : vector<16x1xf32>
    %21 = math.rsqrt %20 : vector<16x1xf32>
    %22 = vector.broadcast %21 : vector<16x1xf32> to vector<16x128xf32>
    %23 = arith.mulf %18, %22 : vector<16x128xf32>
    %cst_10 = arith.constant 0.000000e+00 : f32
    %24 = vector.broadcast %cst_10 : f32 to vector<16x128xf32>
    %25 = arith.maximumf %23, %24 : vector<16x128xf32>
    %26 = arith.truncf %25 : vector<16x128xf32> to vector<16x128xbf16>
    %c0_11 = arith.constant 0 : index
    %c0_12 = arith.constant 0 : index
    %27 = vector.load %arg5[%c0_11, %c0_12] : memref<128x256xbf16, #tpu.memory_space<vmem>>, vector<128x256xbf16>
    %cst_13 = arith.constant dense<0.000000e+00> : vector<16x256xf32>
    %28 = tpu.matmul %26, %27, %cst_13 {dimension_numbers = #tpu.dot_dimension_numbers<[1], [0], [0], [1], [0, 0, 1, 1], [], []>} : vector<16x128xbf16>, vector<128x256xbf16>, vector<16x256xf32> -> vector<16x256xf32>
    %c0_14 = arith.constant 0 : index
    %c0_15 = arith.constant 0 : index
    %29 = vector.load %arg6[%c0_14, %c0_15] : memref<1x256xf32, #tpu.memory_space<vmem>>, vector<1x256xf32>
    %30 = vector.broadcast %29 : vector<1x256xf32> to vector<16x256xf32>
    %31 = arith.addf %28, %30 : vector<16x256xf32>
    %cst_16 = arith.constant dense<0.000000e+00> : vector<16xf32>
    %32 = vector.multi_reduction <add>, %31, %cst_16 [1] : vector<16x256xf32> to vector<16xf32>
    %33 = vector.shape_cast %32 : vector<16xf32> to vector<16x1xf32>
    %cst_17 = arith.constant 2.560000e+02 : f32
    %34 = vector.broadcast %cst_17 : f32 to vector<16x1xf32>
    %35 = arith.divf %33, %34 : vector<16x1xf32>
    %36 = vector.broadcast %35 : vector<16x1xf32> to vector<16x256xf32>
    %37 = arith.subf %31, %36 : vector<16x256xf32>
    %38 = arith.mulf %37, %37 : vector<16x256xf32>
    %cst_18 = arith.constant dense<0.000000e+00> : vector<16xf32>
    %39 = vector.multi_reduction <add>, %38, %cst_18 [1] : vector<16x256xf32> to vector<16xf32>
    %40 = vector.shape_cast %39 : vector<16xf32> to vector<16x1xf32>
    %cst_19 = arith.constant 2.560000e+02 : f32
    %41 = vector.broadcast %cst_19 : f32 to vector<16x1xf32>
    %42 = arith.divf %40, %41 : vector<16x1xf32>
    %43 = vector.broadcast %35 : vector<16x1xf32> to vector<16x256xf32>
    %44 = arith.subf %31, %43 : vector<16x256xf32>
    %cst_20 = arith.constant 9.99999974E-6 : f32
    %45 = vector.broadcast %cst_20 : f32 to vector<16x1xf32>
    %46 = arith.addf %42, %45 : vector<16x1xf32>
    %47 = math.rsqrt %46 : vector<16x1xf32>
    %48 = vector.broadcast %47 : vector<16x1xf32> to vector<16x256xf32>
    %49 = arith.mulf %44, %48 : vector<16x256xf32>
    %cst_21 = arith.constant 0.000000e+00 : f32
    %50 = vector.broadcast %cst_21 : f32 to vector<16x256xf32>
    %51 = arith.maximumf %49, %50 : vector<16x256xf32>
    %cst_22 = arith.constant dense<0xFF800000> : vector<16xf32>
    %52 = vector.multi_reduction <maximumf>, %51, %cst_22 [1] : vector<16x256xf32> to vector<16xf32>
    %53 = vector.shape_cast %52 : vector<16xf32> to vector<16x1xf32>
    %54 = vector.broadcast %53 : vector<16x1xf32> to vector<16x256xf32>
    %55 = arith.subf %51, %54 : vector<16x256xf32>
    %56 = math.exp %55 : vector<16x256xf32>
    %cst_23 = arith.constant dense<0.000000e+00> : vector<16xf32>
    %57 = vector.multi_reduction <add>, %56, %cst_23 [1] : vector<16x256xf32> to vector<16xf32>
    %58 = vector.shape_cast %57 : vector<16xf32> to vector<16x1xf32>
    %59 = tpu.reciprocal %58 {approx = true} : vector<16x1xf32> -> vector<16x1xf32>
    %c0_24 = arith.constant 0 : index
    %c0_25 = arith.constant 0 : index
    %60 = vector.load %arg2[%c0_24, %c0_25] : memref<16x1xf32, #tpu.memory_space<vmem>>, vector<16x1xf32>
    %61 = math.exp %60 : vector<16x1xf32>
    %62 = arith.mulf %61, %59 : vector<16x1xf32>
    %63 = vector.broadcast %62 : vector<16x1xf32> to vector<16x256xf32>
    %64 = arith.mulf %56, %63 : vector<16x256xf32>
    %c0_26 = arith.constant 0 : index
    %c0_27 = arith.constant 0 : index
    %65 = vector.load %arg7[%c0_26, %c0_27] : memref<16x256xf32, #tpu.memory_space<vmem>>, vector<16x256xf32>
    tpu.vector_store %arg7[%c0_26, %c0_27], %64 {strides = array<i32>} : memref<16x256xf32, #tpu.memory_space<vmem>>, vector<16x256xf32>,
    return
  }
  func.func @transform_0(%arg0: i32) -> (i32, i32) {
    %c0_i32 = arith.constant 0 : i32
    %c0_i32_0 = arith.constant 0 : i32
    return %arg0, %c0_i32 : i32, i32
  }
  func.func @transform_1(%arg0: i32) -> (i32, i32) {
    %c0_i32 = arith.constant 0 : i32
    %c0_i32_0 = arith.constant 0 : i32
    return %arg0, %c0_i32 : i32, i32
  }
  func.func @transform_2(%arg0: i32) -> (i32, i32) {
    %c0_i32 = arith.constant 0 : i32
    %c0_i32_0 = arith.constant 0 : i32
    %c0_i32_1 = arith.constant 0 : i32
    return %c0_i32, %c0_i32_0 : i32, i32
  }
  func.func @transform_3(%arg0: i32) -> (i32, i32) {
    %c0_i32 = arith.constant 0 : i32
    %c0_i32_0 = arith.constant 0 : i32
    %c0_i32_1 = arith.constant 0 : i32
    return %c0_i32, %c0_i32_0 : i32, i32
  }
  func.func @transform_4(%arg0: i32) -> (i32, i32) {
    %c0_i32 = arith.constant 0 : i32
    %c0_i32_0 = arith.constant 0 : i32
    %c0_i32_1 = arith.constant 0 : i32
    return %c0_i32, %c0_i32_0 : i32, i32
  }
  func.func @transform_5(%arg0: i32) -> (i32, i32) {
    %c0_i32 = arith.constant 0 : i32
    %c0_i32_0 = arith.constant 0 : i32
    %c0_i32_1 = arith.constant 0 : i32
    return %c0_i32, %c0_i32_0 : i32, i32
  }
  func.func @transform_6(%arg0: i32) -> (i32, i32) {
    %c0_i32 = arith.constant 0 : i32
    %c0_i32_0 = arith.constant 0 : i32
    return %arg0, %c0_i32 : i32, i32
  }
}

</mosaic_0001>

<bundles_post_ra>
// kernel: tpu_custom_call.1
= control target key start
LH: loop header
LB: loop body
LE: loop exit
PB: predicated region body
PF: predicated region fallthrough
CT: control target
= control target key end

     0   :  { %11 = vsyncpa [#allocation3], 0  ;;  %s1190_s0 = inlined_call_operand.vmem [shape: bf16[32,32], index: 0, kind: input, shape index: {}]   ;;  %s1191_s1 = inlined_call_operand.vmem [shape: f32[32,1], index: 1, kind: input, shape index: {}]   ;;  %s1192_s2 = inlined_call_operand.vmem [shape: bf16[32,128], index: 2, kind: input, shape index: {}]   ;;  %s1193_s3 = inlined_call_operand.vmem [shape: f32[1,128], index: 3, kind: input, shape index: {}]   ;;  %s1194_s4 = inlined_call_operand.hbm [shape: bf16[128,256], index: 4, kind: input, shape index: {}]   ;;  %s1195_s5 = inlined_call_operand.vmem [shape: f32[1,256], index: 5, kind: input, shape index: {}]   ;;  %s1196_s6 = inlined_call_operand.hbm [shape: f32[32,256], index: 6, kind: output, shape index: {}]  }
   0x1   :  { %12 = vsyncpa [#allocation4], 0 }
   0x2   :  { %14 = vsyncpa [#allocation4 + $0x1], 0  ;;  %s1034_s21 = smov 0   ;;  %s1036_s22 = smov 0  }
   0x3   :  { %s1038_s23 = smov 0   ;;  %s1040_s24 = smov 0  }
   0x4 LB: > { %s1055_s25 = sadd.s32 4294967295, %s988_s24   ;;  %s733_s26 = sadd.s32 4294967294, %s988_s24   ;;  %s988_s24 = sphi %s1040_s24, %s1212_s24   ;;  %s984_s23 = sphi %s1038_s23, %s1211_s23   ;;  %s980_s22 = sphi %s1036_s22, %s1210_s22   ;;  %s976_s21 = sphi %s1034_s21, %s1209_s21  }
   0x5   : > { %s1059_s27 = sadd.s32 1, %s988_s24   ;;  %s163_s28 = sadd.s32 1, %s984_s23 }
   0x6   : > { %s160_s29 = ssub.s32 %s988_s24, %s1059_s27  ;;  %p173_p0 = scmp.ne.s32.totalorder %s984_s23, %s980_s22 }
   0x7   : > { %p161_p1 = scmp.eq.s32.totalorder %s160_s29, 0  ;;  %p174_p2 = scmp.eq.s32.totalorder %s1055_s25, 1 }
   0x8   : > { %p179_p3 = scmp.ne.s32.totalorder %s980_s22, %s976_s21  ;;  %p180_p4 = scmp.eq.s32.totalorder %s733_s26, 1 }
   0x9   : > { %s1070_s30 = scalar_select %p161_p1, %s984_s23, %s163_s28  }
   0xa   : > { %p1072_p5 = por %p174_p2, %p173_p0  ;;  %p1076_p6 = por %p180_p4, %p179_p3 }
   0xb   : > { %p734_p7 = scmp.ge.s32.totalorder %s988_s24, 1  ;;  %p187_p8 = scmp.lt.s32.totalorder %s988_s24, 3 }
   0xc   : > { %s1200_s7 = scalar_select %p1072_p5, 1, 0 }
   0xd   : > { %s1201_s8 = scalar_select %p1076_p6, 1, 0 }
   0xe   : > { %p1197_p9 = scmp.eq.s32.totalorder %s1055_s25, 0  ;;  %p1083_p10 = pnand %p734_p7, %p187_p8 }
   0xf   : > { %s990_s10 = smov [#allocation2]   ;;  %s894_s15 = scalar_lea.hbm %s1194_s4, 2048 }
  0x10   : > { %s1202_s9 = scalar_select %p1083_p10, 1, 0 }
  0x11   : > { %s205_s11 = sshll.u32 %s990_s10, 4  ;;  %p790_p11 = pneg %p1083_p10  ;;  %s206_s11 = int_to_ptr.vmem [resolvable:$true] %s205_s11 }
  0x12   : > { %p895_p13 = scmp.ne.s32.totalorder %s1194_s4, %s894_s15  ;;  %p901_p3 = scmp.lt.u32.totalorder %s894_s15, %s1194_s4 }
  0x13   : > { %p1091_p12 = pnand %p1197_p9, %p790_p11 }
  0x15   : > { %p896_p0 = pneg %p1091_p12 }
  0x17   : > { %p897_p1 = pnand %p896_p0, %p895_p13 }
  0x19   : > { %p898_p2 = pneg %p897_p1 }
  0x1b   : > { %p903_p4 = pnand %p901_p3, %p898_p2 }
  0x1d   : > { %906 = shalt.err (!%p903_p4)
}
  0x1e   : > { %s907_s20 = scalar_lea.vmem %s206_s11, 2048  ;;  %p915_p9 = scmp.lt.s32.totalorder %s206_s11, %s206_s11 }
  0x1f   : > { %p908_p7 = scmp.ne.s32.totalorder %s206_s11, %s907_s20  ;;  %p916_p6 = scmp.lt.s32.totalorder %s907_s20, %s907_s20 }
  0x21   : > { %p910_p8 = pnand %p908_p7, %p896_p0  ;;  %p917_p5 = por %p916_p6, %p915_p9 }
  0x23   : > { %p911_p11 = pneg %p910_p8 }
  0x25   : > { %p918_p10 = pnand %p917_p5, %p911_p11 }
  0x27   : > { %921 = shalt.err (!%p918_p10)
}
  0x28   : > { %s991_s26 = smov 128   ;;  %s992_s28 = smov 8  }
  0x29   : > { %793 = dma.hbm_to_vmem [thread:$0]  (!%p1091_p12), %s1194_s4, 2048, %s206_s11, [#allocation3], %s991_s26, %s991_s26, %s992_s28  }
  0x2a   : > { %p1204_p13 = scmp.ne.s32.totalorder %s1202_s9, 0 }
  0x2b   : > { %p1205_p1 = scmp.eq.s32.totalorder (!%p1204_p13), %s1055_s25, 0 }
  0x2c   : > { %242 = sbr.rel (%p1204_p13) target bundleno = 1582 (0x62e), region = 44 }
  0x33   : > { %967 = dma.done.wait (%p1205_p1), [#allocation3], 2048   ;;  %p1206_p0 = pmov %p1205_p1 }
  0x34   : > { %s740_s13 = sshll.u32 %s1055_s25, 1  ;;  %v993_v0 = vmov 0.0   ;;  %vm994_vm0 = vmmov 0   ;;  %v843_v1 = vld [vmem:[%s1192_s2] sm:$0xff]   ;;  %v844_v2 = vld [vmem:[%s1192_s2 + $0x8] sm:$0xff]   ;;  %vm321_vm1 = vcmask 261120   ;;  %v410_v49 = vlaneseq }
  0x35   : > { %969 = vsyncadd (%p1206_p0), [#allocation3], 4294965248  ;;  %776 = vmatprep.subr.bf16.mxu0 %v993_v0  ;;  %780 = vmatprep.mubr.msk.bf16.mxu0 %vm994_vm0, %v993_v0  ;;  %p278_p5 = scmp.lt.s32.totalorder %s740_s13, 3  ;;  %v744_v4 = vld [vmem:[%s1193_s3] ss:$0 sm:$0xff]  ;;  %v995_v32 = vmov 0  }
  0x36   : > { %777 = vmatpush3.bf16.msra.mxu0 %v843_v1  ;;  %v846_v11 = vld [vmem:[#allocation2 + $0x4] ss:$8 sps:$4 sm:$0xff]   ;;  %v848_v12 = vld [vmem:[#allocation2] ss:$8 sps:$4 sm:$0xff]   ;;  %v849_v13 = vld [vmem:[#allocation2 + $0x14] ss:$8 sps:$4 sm:$0xff]   ;;  %532 = vmatprep.mubr.bf16.mxu1 %v995_v32 }
  0x37   : > { %s1214_s13 = smov (!%p278_p5, %s740_s13), 3  ;;  %778 = vmatprep.subr.bf16.mxu0 %v993_v0  ;;  %500 = vmatprep.subr.bf16.mxu1 %v846_v11  ;;  %v851_v14 = vld [vmem:[#allocation2 + $0x10] ss:$8 sps:$4 sm:$0xff]   ;;  %v852_v23 = vld [vmem:[#allocation2 + $0x24] ss:$8 sps:$4 sm:$0xff]   ;;  %v411_v50 = vshrl.u32 %v410_v49, 7 }
  0x38   : > { %s741_s11 = sshll.u32 %s1214_s13, 2  ;;  %501 = vmatpush1.bf16.msra.mxu1 %v848_v12  ;;  %v854_v24 = vld [vmem:[#allocation2 + $0x20] ss:$8 sps:$4 sm:$0xff]   ;;  %v855_v25 = vld [vmem:[#allocation2 + $0x34] ss:$8 sps:$4 sm:$0xff]   ;;  %841 = vset.pattern.permute.xlu0 %v995_v32  ;;  %s743_s29 = sshll.u32 %s1214_s13, 3 }
  0x39   : > { %s281_s16 = scalar_lea.vmem %s1190_s0, %s741_s11  ;;  %502 = vmatprep.subr.bf16.mxu1 %v849_v13  ;;  %v857_v26 = vld [vmem:[#allocation2 + $0x30] ss:$8 sps:$4 sm:$0xff]   ;;  %v858_v27 = vld [vmem:[#allocation2 + $0x44] ss:$8 sps:$4 sm:$0xff]   ;;  %v860_v28 = vld [vmem:[#allocation2 + $0x40] ss:$8 sps:$4 sm:$0xff]   ;;  %842 = vset.pattern.permute.xlu1 %v995_v32  ;;  %s287_s12 = scalar_lea.vmem %s1191_s1, %s743_s29 }
  0x3a   : > { %v845_v3 = vld [vmem:[%s281_s16] sm:$0xff]   ;;  %779 = vmatpush3.bf16.msra.mxu0 %v844_v2  ;;  %v861_v29 = vld [vmem:[#allocation2 + $0x54] ss:$8 sps:$4 sm:$0xff]   ;;  %v863_v30 = vld [vmem:[#allocation2 + $0x50] ss:$8 sps:$4 sm:$0xff]   ;;  %v412_v51 = vsub.s32 0, %v411_v50 }
  0x3b   : > { %v864_v31 = vld [vmem:[#allocation2 + $0x64] ss:$8 sps:$4 sm:$0xff]   ;;  %v866_v33 = vld [vmem:[#allocation2 + $0x60] ss:$8 sps:$4 sm:$0xff]   ;;  %v867_v34 = vld [vmem:[#allocation2 + $0x74] ss:$8 sps:$4 sm:$0xff]  }
  0x3c   : > { %503 = vmatpush1.bf16.msra.mxu1 %v851_v14  ;;  %v869_v35 = vld [vmem:[#allocation2 + $0x70] ss:$8 sps:$4 sm:$0xff]   ;;  %v408_v52 = vld [vmem:[%s1195_s5] sm:$0x3]  ;;  %v416_v53 = vsub.s32 1, %v411_v50  ;;  %s274_s13 = sand.u32 1, %s980_s22  }
  0x3d   : > { %781 = vmatmul.mubr.msk.bf16.vlgmr.msra.gmra.mrb[0].mxu0 %vm321_vm1, %v845_v3  ;;  %504 = vmatprep.subr.bf16.mxu1 %v852_v23  ;;  %v413_v54 = vrot.slane %v408_v52, %v412_v51  ;;  %v606_v50 = vld [vmem:[%s287_s12] sm:$0xff]  ;;  %v607_v51 = vld [vmem:[%s287_s12 + $0x8] sm:$0xff]  ;;  %s739_s9 = sshll.u32 %s274_s13, 5  ;;  %s772_s16 = sshll.u32 %s1055_s25, 9 }
  0x3e   : > { %v417_v55 = vrot.slane %v408_v52, %v416_v53  ;;  %v608_v52 = vmul.f32 1.442695, %v606_v50  ;;  %v610_v53 = vmul.f32 1.442695, %v607_v51  ;;  %s276_s14 = scalar_lea.vmem [#allocation5], %s739_s9  ;;  %s1147_s19 = scalar_lea.hbm %s1196_s6, %s772_s16 }
  0x3f   : > { %s647_s15 = sshll.u32 %s276_s14, 4  ;;  %s1149_s25 = scalar_lea.sflag [#allocation4], %s274_s13  ;;  %s1142_s15 = int_to_ptr.vmem [resolvable:$true] %s647_s15 }
  0x40   : > { %505 = vmatpush1.bf16.msra.mxu1 %v854_v24  ;;  %s922_s20 = scalar_lea.vmem %s1142_s15, 512  ;;  %p1207_p9 = scmp.ne.s32.totalorder %s1200_s7, 0 }
  0x41   : > { %506 = vmatprep.subr.bf16.mxu1 %v855_v25  ;;  %p923_p6 = scmp.ne.s32.totalorder %s1142_s15, %s922_s20  ;;  %s996_s26 = smov [#allocation5]  }
  0x42   : > { %s926_s28 = sshll.u32 %s996_s26, 4  ;;  %s927_s28 = int_to_ptr.vmem [resolvable:$false] %s926_s28 }
  0x43   : > { %p924_p10 = pnand %p923_p6, %p1207_p9  ;;  %s928_s29 = scalar_lea.vmem %s927_s28, 1024 }
  0x44   : > { %507 = vmatpush1.bf16.msra.mxu1 %v857_v26  ;;  %p929_p2 = scmp.lt.s32.totalorder %s1142_s15, %s927_s28  ;;  %p930_p3 = scmp.lt.s32.totalorder %s928_s29, %s922_s20 }
  0x45   : > { %508 = vmatprep.subr.bf16.mxu1 %v858_v27  ;;  %p925_p12 = pneg %p924_p10 }
  0x46   : > { %p931_p4 = por %p930_p3, %p929_p2 }
  0x48   : > { %509 = vmatpush1.bf16.msra.mxu1 %v860_v28  ;;  %p932_p7 = pnand %p931_p4, %p925_p12 }
  0x49   : > { %510 = vmatprep.subr.bf16.mxu1 %v861_v29 }
  0x4c   : > { %511 = vmatpush1.bf16.msra.mxu1 %v863_v30 }
  0x4d   : > { %512 = vmatprep.subr.bf16.mxu1 %v864_v31 }
  0x50   : > { %513 = vmatpush1.bf16.msra.mxu1 %v866_v33 }
  0x51   : > { %514 = vmatprep.subr.bf16.mxu1 %v867_v34 }
  0x54   : > { %515 = vmatpush1.bf16.msra.mxu1 %v869_v35 }
 0x110   : > { %v359_v5 = vpop.f32.mrb[0].mxu0 }
 0x111   : > { %v360_v6 = vadd.f32 %v744_v4, %v359_v5  ;;  %v782_v7 = vpop.f32.mrb[1].mxu0 }
 0x112   : > { %v362_v8 = vpop.f32.mrb[2].mxu0 }
 0x113   : > { %366 = vadd.xlane.f32.xlu0 %v360_v6  ;;  %v783_v9 = vpop.f32.mrb[3].mxu0  ;;  %v363_v10 = vadd.f32 %v744_v4, %v362_v8 }
 0x117   : > { %368 = vadd.xlane.f32.xlu0 %v363_v10 }
 0x1a0   : > { %v367_v15 = vpop.xlane.xlu0 %366 }
 0x1a1   : > { %v371_v16 = vmul.f32 0.0078125, %v367_v15 }
 0x1a3   : > { %v373_v17 = vsub.f32 %v360_v6, %v371_v16 }
 0x1a4   : > { %v369_v18 = vpop.xlane.xlu0 %368 }
 0x1a5   : > { %v372_v19 = vmul.f32 0.0078125, %v369_v18  ;;  %v375_v20 = vmul.f32 %v373_v17, %v373_v17 }
 0x1a7   : > { %v374_v21 = vsub.f32 %v363_v10, %v372_v19  ;;  %377 = vadd.xlane.f32.xlu1 %v375_v20 }
 0x1a9   : > { %v376_v22 = vmul.f32 %v374_v21, %v374_v21 }
 0x1ab   : > { %379 = vadd.xlane.f32.xlu1 %v376_v22 }
 0x234   : > { %v378_v36 = vpop.xlane.xlu1 %377 }
 0x235   : > { %v381_v37 = vmul.f32 0.0078125, %v378_v36 }
 0x237   : > { %v383_v38 = vadd.f32 1e-05, %v381_v37 }
 0x238   : > { %v380_v39 = vpop.xlane.xlu1 %379 }
 0x239   : > { %870 = vrsqrt.f32 %v383_v38  ;;  %v382_v40 = vmul.f32 0.0078125, %v380_v39 }
 0x23b   : > { %v384_v41 = vadd.f32 1e-05, %v382_v40 }
 0x23d   : > { %872 = vrsqrt.f32 %v384_v41 }
 0x243   : > { %v871_v42 = vpop.eup %870 }
 0x244   : > { %v387_v43 = vmul.f32 %v871_v42, %v373_v17 }
 0x246   : > { %v389_v46 = vmax.f32 %v387_v43, 0.0 }
 0x247   : > { %v873_v44 = vpop.eup %872 }
 0x248   : > { %v388_v45 = vmul.f32 %v873_v44, %v374_v21 }
 0x24a   : > { %v390_v47 = vmax.f32 %v388_v45, 0.0 }
 0x24c   : > { %v391_v48 = vpack.c.bf16 %v390_v47, %v389_v46 }
 0x24e   : > { %533 = vmatmul.mubr.bf16.vlgmr.msra.gmra.mrb[0].mxu1 %v391_v48 }
 0x321   : > { %v534_v56 = vpop.f32.mrb[0].mxu1 }
 0x322   : > { %v535_v57 = vadd.f32 %v534_v56, %v413_v54  ;;  %v536_v58 = vpop.f32.mrb[1].mxu1 }
 0x323   : > { %v537_v59 = vadd.f32 %v536_v58, %v417_v55  ;;  %v538_v60 = vpop.f32.mrb[2].mxu1 }
 0x324   : > { %v539_v61 = vadd.f32 %v538_v60, %v413_v54  ;;  %v540_v62 = vpop.f32.mrb[3].mxu1 }
 0x325   : > { %v541_v63 = vadd.f32 %v540_v62, %v417_v55  ;;  %v543_v0 = vadd.f32 %v537_v59, %v535_v57 }
 0x327   : > { %544 = vadd.xlane.f32.xlu0 %v543_v0  ;;  %v546_v1 = vadd.f32 %v541_v63, %v539_v61 }
 0x329   : > { %547 = vadd.xlane.f32.xlu1 %v546_v1 }
 0x3b4   : > { %v545_v2 = vpop.xlane.xlu0 %544 }
 0x3b5   : > { %v550_v3 = vmul.f32 0.00390625, %v545_v2 }
 0x3b6   : > { %v548_v4 = vpop.xlane.xlu1 %547 }
 0x3b7   : > { %v552_v5 = vsub.f32 %v535_v57, %v550_v3  ;;  %v553_v6 = vsub.f32 %v537_v59, %v550_v3  ;;  %v551_v7 = vmul.f32 0.00390625, %v548_v4 }
 0x3b9   : > { %v554_v8 = vsub.f32 %v539_v61, %v551_v7  ;;  %v555_v9 = vsub.f32 %v541_v63, %v551_v7  ;;  %v556_v10 = vmul.f32 %v552_v5, %v552_v5  ;;  %v557_v11 = vmul.f32 %v553_v6, %v553_v6 }
 0x3bb   : > { %v560_v12 = vadd.f32 %v557_v11, %v556_v10  ;;  %v558_v13 = vmul.f32 %v554_v8, %v554_v8  ;;  %v559_v14 = vmul.f32 %v555_v9, %v555_v9 }
 0x3bd   : > { %561 = vadd.xlane.f32.xlu0 %v560_v12  ;;  %v563_v15 = vadd.f32 %v559_v14, %v558_v13 }
 0x3bf   : > { %564 = vadd.xlane.f32.xlu1 %v563_v15 }
 0x44a   : > { %v562_v16 = vpop.xlane.xlu0 %561 }
 0x44b   : > { %v566_v17 = vmul.f32 0.00390625, %v562_v16 }
 0x44c   : > { %v565_v18 = vpop.xlane.xlu1 %564 }
 0x44d   : > { %v568_v19 = vadd.f32 1e-05, %v566_v17  ;;  %v567_v20 = vmul.f32 0.00390625, %v565_v18 }
 0x44f   : > { %874 = vrsqrt.f32 %v568_v19  ;;  %v569_v21 = vadd.f32 1e-05, %v567_v20 }
 0x451   : > { %876 = vrsqrt.f32 %v569_v21 }
 0x459   : > { %v875_v22 = vpop.eup %874 }
 0x45a   : > { %v572_v23 = vmul.f32 %v875_v22, %v552_v5  ;;  %v573_v24 = vmul.f32 %v875_v22, %v553_v6 }
 0x45b   : > { %v877_v25 = vpop.eup %876 }
 0x45c   : > { %v576_v26 = vmax.f32 %v572_v23, 0.0  ;;  %v577_v27 = vmax.f32 %v573_v24, 0.0  ;;  %v574_v28 = vmul.f32 %v877_v25, %v554_v8  ;;  %v575_v29 = vmul.f32 %v877_v25, %v555_v9 }
 0x45e   : > { %v580_v30 = vmax.f32 %v576_v26, %v577_v27  ;;  %v578_v31 = vmax.f32 %v574_v28, 0.0  ;;  %v579_v32 = vmax.f32 %v575_v29, 0.0 }
 0x460   : > { %581 = vmax.xlane.f32.xlu0 %v580_v30  ;;  %v583_v33 = vmax.f32 %v578_v31, %v579_v32 }
 0x462   : > { %584 = vmax.xlane.f32.xlu1 %v583_v33 }
 0x4ed   : > { %v582_v34 = vpop.xlane.xlu0 %581 }
 0x4ee   : > { %v586_v35 = vsub.f32 %v576_v26, %v582_v34  ;;  %v587_v36 = vsub.f32 %v577_v27, %v582_v34 }
 0x4ef   : > { %v585_v37 = vpop.xlane.xlu1 %584 }
 0x4f0   : > { %v590_v38 = vmul.f32 1.442695, %v586_v35  ;;  %v592_v39 = vmul.f32 1.442695, %v587_v36  ;;  %v588_v40 = vsub.f32 %v578_v31, %v585_v37  ;;  %v589_v41 = vsub.f32 %v579_v32, %v585_v37 }
 0x4f2   : > { %878 = vpow2.f32 %v590_v38  ;;  %v594_v42 = vmul.f32 1.442695, %v588_v40  ;;  %v596_v43 = vmul.f32 1.442695, %v589_v41 }
 0x4f3   : > { %880 = vpow2.f32 %v592_v39 }
 0x4f4   : > { %882 = vpow2.f32 %v594_v42 }
 0x4f5   : > { %884 = vpow2.f32 %v596_v43 }
 0x4f6   : > { %886 = vpow2.f32 %v608_v52 }
 0x4f7   : > { %888 = vpow2.f32 %v610_v53 }
 0x4fc   : > { %v879_v44 = vpop.eup %878 }
 0x4fd   : > { %v881_v45 = vpop.eup %880 }
 0x4fe   : > { %v883_v46 = vpop.eup %882  ;;  %v598_v47 = vadd.f32 %v881_v45, %v879_v44 }
 0x4ff   : > { %v885_v48 = vpop.eup %884 }
 0x500   : > { %599 = vadd.xlane.f32.xlu0 %v598_v47  ;;  %v601_v49 = vadd.f32 %v885_v48, %v883_v46  ;;  %v887_v56 = vpop.eup %886 }
 0x501   : > { %v889_v57 = vpop.eup %888 }
 0x502   : > { %602 = vadd.xlane.f32.xlu1 %v601_v49 }
 0x58d   : > { %v600_v54 = vpop.xlane.xlu0 %599 }
 0x58e   : > { %890 = vrcp.f32 %v600_v54 }
 0x58f   : > { %v603_v55 = vpop.xlane.xlu1 %602 }
 0x590   : > { %892 = vrcp.f32 %v603_v55 }
 0x598   : > { %v891_v58 = vpop.eup %890 }
 0x599   : > { %v612_v59 = vmul.f32 %v891_v58, %v887_v56 }
 0x59a   : > { %v893_v60 = vpop.eup %892 }
 0x59b   : > { %616 = vperm.xlu0 %841, %v612_v59   ;;  %v613_v61 = vmul.f32 %v893_v60, %v889_v57 }
 0x59d   : > { %621 = vperm.xlu1 %842, %v613_v61  }
 0x61a   : > { %v617_v62 = vpop.permute.xlu0 %616 }
 0x61b   : > { %v624_v63 = vmul.f32 %v879_v44, %v617_v62  ;;  %v625_v0 = vmul.f32 %v881_v45, %v617_v62 }
 0x61c   : > { %v622_v1 = vpop.permute.xlu1 %621 }
 0x61d   : > { %628 = vst [vmem:[%s276_s14] sm:$0xff] %v624_v63  ;;  %629 = vst [vmem:[%s276_s14 + $0x8] sm:$0xff] %v625_v0  ;;  %v626_v2 = vmul.f32 %v883_v46, %v622_v1  ;;  %v627_v3 = vmul.f32 %v885_v48, %v622_v1 }
 0x61f   : > { %630 = vst [vmem:[%s276_s14 + $0x10] sm:$0xff] %v626_v2  ;;  %631 = vst [vmem:[%s276_s14 + $0x18] sm:$0xff] %v627_v3 }
 0x620   : > { %935 = shalt.err (!%p932_p7)
}
 0x621   : > { %s936_s10 = scalar_lea.hbm %s1147_s19, 512  ;;  %s940_s13 = scalar_lea.hbm %s1196_s6, 1024 }
 0x622   : > { %p937_p8 = scmp.ne.s32.totalorder %s1147_s19, %s936_s10  ;;  %p941_p1 = scmp.lt.u32.totalorder %s1147_s19, %s1196_s6 }
 0x623   : > { %p942_p0 = scmp.lt.u32.totalorder %s940_s13, %s936_s10  ;;  %p944_p6 = scmp.lt.u32.totalorder %s936_s10, %s1147_s19 }
 0x624   : > { %p938_p11 = pnand %p937_p8, %p1207_p9 }
 0x625   : > { %p943_p5 = por %p942_p0, %p941_p1 }
 0x626   : > { %p939_p13 = pneg %p938_p11 }
 0x627   : > { %p945_p10 = por %p944_p6, %p943_p5 }
 0x629   : > { %p946_p12 = pnand %p945_p10, %p939_p13 }
 0x62b   : > { %949 = shalt.err (!%p946_p12)
}
 0x62c   : > { %s997_s16 = smov 256   ;;  %s998_s17 = smov 16  }
 0x62d   : > { %788 = dma.vmem_to_hbm [thread:$0]  (%p1207_p9), %s1142_s15, 512, %s1147_s19, %s1149_s25, %s997_s16, %s997_s16, %s998_s17  }
 0x62e PF: > { %p800_p2 = scmp.ge.s32.totalorder %s988_s24, 2  ;;  %s662_s18 = sand.u32 1, %s976_s21  }
 0x62f   : > { %p1208_p3 = scmp.ne.s32.totalorder %s1201_s8, 0  ;;  %s663_s20 = scalar_lea.sflag [#allocation4], %s662_s18 }
 0x631   : > { %p795_p4 = pnand %p800_p2, %p1208_p3 }
 0x633   : > { %971 = dma.done.wait (!%p795_p4), %s663_s20, 512  }
 0x634   : > { %973 = vsyncadd (!%p795_p4), %s663_s20, 4294966784  ;;  %p17_p7 = scmp.ge.s32.totalorder %s1059_s27, 4   ;;  %s1209_s21 = smov %s980_s22 }
 0x635   : > { %s1210_s22 = smov %s984_s23  ;;  %s1211_s23 = smov %s1070_s30 }
 0x636   : > { %s1212_s24 = smov %s1059_s27  ;;  %19 = sbr.rel (!%p17_p7) target bundleno = 4 (0x4), region = 87 }
 0x63d   :  { %668 = vsyncpa [#allocation3], 1 }
 0x63e   :  { %670 = vsyncpa [#allocation3 + $0x1], 1 }
 0x63f   :  { %671 = vsyncpa [#allocation4], 1 }
 0x640   :  { %673 = vsyncpa [#allocation4 + $0x1], 1 }

</bundles_post_ra>
